<compile_context>
chip_gen: v7x
topology: tpu7x:2x2x1
jax: 0.10.0
libtpu: 0.0.40
codegen_flags: <defaults>
</compile_context>

<pallas_src>
import jax
import jax.numpy as jnp
from jax import lax
from jax.experimental import pallas as pl
from jax.experimental.pallas import tpu as pltpu

K = 15                       # k = 15 -> n_hidden
N_INPUT = 8                  # n_features (synthetic; the source data frame is empty)
N_HIDDEN = K
N_OUTPUT = 2
DROP_P = 0.3
KEEP_P = 1.0 - DROP_P
KEEP_THRESH_INT = int(KEEP_P * (2 ** 32))   # uniform-u32 threshold for keep prob
LEAKY_SLOPE = 0.01           # nn.LeakyReLU default negative_slope
BLOCK_B = 1024               # batch tile (lane) width; multiple of 128


def _round_up(n, m):
    return ((n + m - 1) // m) * m


def _hash_u32(idx_u32, seed_u32):
    """murmur3-style finalizer: uniform uint32 per element (same in/out of kernel)."""
    h = idx_u32 ^ seed_u32
    h = h ^ (h >> jnp.uint32(16))
    h = h * jnp.uint32(0x85EBCA6B)
    h = h ^ (h >> jnp.uint32(13))
    h = h * jnp.uint32(0xC2B2AE35)
    h = h ^ (h >> jnp.uint32(16))
    return h


def fcn_kernel(seed_ref, x_ref, w1_ref, b1_ref, w2_ref, b2_ref, out_ref):
    # x_ref: [N_INPUT, TB]  (batch on the lane axis)
    x = x_ref[...]
    tb = x_ref.shape[1]

    # ---- Dropout(p=0.3), training semantics (scale folded into w1 by wrapper) ----
    rows = lax.broadcasted_iota(jnp.int32, x.shape, 0)                  # feature idx
    cols = lax.broadcasted_iota(jnp.int32, x.shape, 1) + pl.program_id(0) * tb
    idx = (cols * N_INPUT + rows).astype(jnp.uint32)                    # global elem id
    h = _hash_u32(idx, seed_ref[0].astype(jnp.uint32))
    x = jnp.where(h < jnp.uint32(KEEP_THRESH_INT), x, 0.0)

    # ---- Linear 1 (+ bias broadcast over lanes) + LeakyReLU ----
    h1 = jnp.dot(w1_ref[...], x, preferred_element_type=jnp.float32) + b1_ref[...]
    h1 = jnp.where(h1 > 0.0, h1, LEAKY_SLOPE * h1)

    # ---- Linear 2 ----
    out = jnp.dot(w2_ref[...], h1, preferred_element_type=jnp.float32) + b2_ref[...]
    out_ref[...] = out.astype(out_ref.dtype)


def _fcn_forward(x, w1, b1, w2, b2, seed):
    """x: [B, n_input] f32 -> [B, n_output] f32. Weights in PyTorch layout:
    w1 [n_hidden, n_input], b1 [n_hidden, 1], w2 [n_output, n_hidden], b2 [n_output, 1]."""
    B = x.shape[0]
    TB = min(BLOCK_B, _round_up(max(B, 1), 128))
    B_pad = _round_up(B, TB)

    xt = x.T                                             # [N_INPUT, B]
    if B_pad != B:
        xt = jnp.pad(xt, ((0, 0), (0, B_pad - B)))

    w1s = (w1 * (1.0 / KEEP_P)).astype(jnp.float32)      # fold inverted-dropout scale

    grid = (B_pad // TB,)
    out_t = pl.pallas_call(
        fcn_kernel,
        out_shape=jax.ShapeDtypeStruct((N_OUTPUT, B_pad), jnp.float32),
        grid_spec=pltpu.PrefetchScalarGridSpec(
            num_scalar_prefetch=1,
            grid=grid,
            in_specs=[
                pl.BlockSpec((N_INPUT, TB), lambda i, s: (0, i)),        # x^T tile
                pl.BlockSpec((N_HIDDEN, N_INPUT), lambda i, s: (0, 0)),  # w1 (resident)
                pl.BlockSpec((N_HIDDEN, 1), lambda i, s: (0, 0)),        # b1 (resident)
                pl.BlockSpec((N_OUTPUT, N_HIDDEN), lambda i, s: (0, 0)), # w2 (resident)
                pl.BlockSpec((N_OUTPUT, 1), lambda i, s: (0, 0)),        # b2 (resident)
            ],
            out_specs=pl.BlockSpec((N_OUTPUT, TB), lambda i, s: (0, i)),
        ),
        compiler_params=pltpu.CompilerParams(
            dimension_semantics=("parallel",),
        ),
    )(seed, xt, w1s, b1, w2, b2)

    return out_t[:, :B].T


fcn_forward = jax.jit(_fcn_forward)


def fcn_reference(x, w1, b1, w2, b2, seed):
    """Pure-JAX reference using the identical hash-based dropout mask."""
    B = x.shape[0]
    b_idx = jnp.arange(B, dtype=jnp.int32)[:, None]
    f_idx = jnp.arange(N_INPUT, dtype=jnp.int32)[None, :]
    idx = (b_idx * N_INPUT + f_idx).astype(jnp.uint32)
    h = _hash_u32(idx, seed[0].astype(jnp.uint32))
    keep = h < jnp.uint32(KEEP_THRESH_INT)
    xd = jnp.where(keep, x / KEEP_P, 0.0)
    h1 = xd @ w1.T + b1.reshape(1, -1)
    h1 = jnp.where(h1 > 0.0, h1, LEAKY_SLOPE * h1)
    return h1 @ w2.T + b2.reshape(1, -1)


def init_params(key):
    """Mimics nn.Linear init U(-1/sqrt(fan_in), 1/sqrt(fan_in)), torch weight layout."""
    k1, k2, k3, k4 = jax.random.split(key, 4)
    lim1 = 1.0 / (N_INPUT ** 0.5)
    lim2 = 1.0 / (N_HIDDEN ** 0.5)
    w1 = jax.random.uniform(k1, (N_HIDDEN, N_INPUT), jnp.float32, -lim1, lim1)
    b1 = jax.random.uniform(k2, (N_HIDDEN, 1), jnp.float32, -lim1, lim1)
    w2 = jax.random.uniform(k3, (N_OUTPUT, N_HIDDEN), jnp.float32, -lim2, lim2)
    b2 = jax.random.uniform(k4, (N_OUTPUT, 1), jnp.float32, -lim2, lim2)
    return w1, b1, w2, b2


if __name__ == "__main__":
    key = jax.random.PRNGKey(0)
    k_x, k_p = jax.random.split(key)

    B = 8
    x = jax.random.normal(k_x, (B, N_INPUT), jnp.float32)
    w1, b1, w2, b2 = init_params(k_p)
    seed = jnp.array([1234], dtype=jnp.int32)

    out = fcn_forward(x, w1, b1, w2, b2, seed)
    out = jax.block_until_ready(out)
    ref = fcn_reference(x, w1, b1, w2, b2, seed)

    assert out.shape == (B, N_OUTPUT)
    assert out.dtype == jnp.float32
    assert bool(jnp.all(jnp.isfinite(out)))
    assert bool(jnp.allclose(out, ref, atol=1e-3, rtol=1e-3))
    print("KERNEL_OK")
</pallas_src>

<mosaic_0001>
module attributes {stable_mosaic.version = 11 : i64} {
  func.func @fcn_kernel(%arg0: i32, %arg1: memref<1xi32, #tpu.memory_space<smem>>, %arg2: memref<8x128xf32, #tpu.memory_space<vmem>>, %arg3: memref<15x8xf32, #tpu.memory_space<vmem>>, %arg4: memref<15x1xf32, #tpu.memory_space<vmem>>, %arg5: memref<2x15xf32, #tpu.memory_space<vmem>>, %arg6: memref<2x1xf32, #tpu.memory_space<vmem>>, %arg7: memref<2x128xf32, #tpu.memory_space<vmem>>) attributes {dimension_semantics = [#tpu.dimension_semantics<parallel>], iteration_bounds = array<i64: 1>, scalar_prefetch = 1 : i64, scratch_operands = 0 : i64, tpu.core_type = #tpu.core_type<tc>, window_params = [{transform_indices = @transform_0, window_bounds = array<i64: 8, 128>}, {pipeline_mode = #tpu.pipeline_mode<synchronous>, transform_indices = @transform_1, window_bounds = array<i64: 15, 8>}, {pipeline_mode = #tpu.pipeline_mode<synchronous>, transform_indices = @transform_2, window_bounds = array<i64: 15, 1>}, {pipeline_mode = #tpu.pipeline_mode<synchronous>, transform_indices = @transform_3, window_bounds = array<i64: 2, 15>}, {pipeline_mode = #tpu.pipeline_mode<synchronous>, transform_indices = @transform_4, window_bounds = array<i64: 2, 1>}, {transform_indices = @transform_5, window_bounds = array<i64: 2, 128>}]} {
    %c0 = arith.constant 0 : index
    %c0_0 = arith.constant 0 : index
    %0 = vector.load %arg2[%c0, %c0_0] : memref<8x128xf32, #tpu.memory_space<vmem>>, vector<8x128xf32>
    %1 = tpu.iota {dimensions = array<i32: 0>} : vector<8x128xi32>
    %2 = tpu.iota {dimensions = array<i32: 1>} : vector<8x128xi32>
    %c128_i32 = arith.constant 128 : i32
    %3 = arith.muli %arg0, %c128_i32 : i32
    %4 = vector.broadcast %3 : i32 to vector<8x128xi32>
    %5 = arith.addi %2, %4 : vector<8x128xi32>
    %c8_i32 = arith.constant 8 : i32
    %6 = vector.broadcast %c8_i32 : i32 to vector<8x128xi32>
    %7 = arith.muli %5, %6 : vector<8x128xi32>
    %8 = arith.addi %7, %1 : vector<8x128xi32>
    %c0_1 = arith.constant 0 : index
    %9 = memref.load %arg1[%c0_1] : memref<1xi32, #tpu.memory_space<smem>>
    %10 = vector.broadcast %9 : i32 to vector<8x128xi32>
    %11 = arith.xori %8, %10 : vector<8x128xi32>
    %c16_i32 = arith.constant 16 : i32
    %12 = vector.broadcast %c16_i32 : i32 to vector<8x128xi32>
    %13 = arith.shrui %11, %12 : vector<8x128xi32>
    %14 = arith.xori %11, %13 : vector<8x128xi32>
    %c-2048144789_i32 = arith.constant -2048144789 : i32
    %15 = vector.broadcast %c-2048144789_i32 : i32 to vector<8x128xi32>
    %16 = arith.muli %14, %15 : vector<8x128xi32>
    %c13_i32 = arith.constant 13 : i32
    %17 = vector.broadcast %c13_i32 : i32 to vector<8x128xi32>
    %18 = arith.shrui %16, %17 : vector<8x128xi32>
    %19 = arith.xori %16, %18 : vector<8x128xi32>
    %c-1028477387_i32 = arith.constant -1028477387 : i32
    %20 = vector.broadcast %c-1028477387_i32 : i32 to vector<8x128xi32>
    %21 = arith.muli %19, %20 : vector<8x128xi32>
    %c16_i32_2 = arith.constant 16 : i32
    %22 = vector.broadcast %c16_i32_2 : i32 to vector<8x128xi32>
    %23 = arith.shrui %21, %22 : vector<8x128xi32>
    %24 = arith.xori %21, %23 : vector<8x128xi32>
    %c-1288490189_i32 = arith.constant -1288490189 : i32
    %25 = vector.broadcast %c-1288490189_i32 : i32 to vector<8x128xi32>
    %26 = arith.cmpi ult, %24, %25 : vector<8x128xi32>
    %cst = arith.constant 0.000000e+00 : f32
    %27 = vector.broadcast %cst : f32 to vector<8x128xf32>
    %28 = arith.select %26, %0, %27 : vector<8x128xi1>, vector<8x128xf32>
    %c0_3 = arith.constant 0 : index
    %c0_4 = arith.constant 0 : index
    %29 = vector.load %arg3[%c0_3, %c0_4] : memref<15x8xf32, #tpu.memory_space<vmem>>, vector<15x8xf32>
    %cst_5 = arith.constant dense<0.000000e+00> : vector<15x128xf32>
    %30 = tpu.matmul %29, %28, %cst_5 {dimension_numbers = #tpu.dot_dimension_numbers<[1], [0], [0], [1], [0, 0, 1, 1], [], []>} : vector<15x8xf32>, vector<8x128xf32>, vector<15x128xf32> -> vector<15x128xf32>
    %c0_6 = arith.constant 0 : index
    %c0_7 = arith.constant 0 : index
    %31 = vector.load %arg4[%c0_6, %c0_7] : memref<15x1xf32, #tpu.memory_space<vmem>>, vector<15x1xf32>
    %32 = vector.broadcast %31 : vector<15x1xf32> to vector<15x128xf32>
    %33 = arith.addf %30, %32 : vector<15x128xf32>
    %cst_8 = arith.constant 0.000000e+00 : f32
    %34 = vector.broadcast %cst_8 : f32 to vector<15x128xf32>
    %35 = arith.cmpf ogt, %33, %34 : vector<15x128xf32>
    %cst_9 = arith.constant 0.00999999977 : f32
    %36 = vector.broadcast %cst_9 : f32 to vector<15x128xf32>
    %37 = arith.mulf %36, %33 : vector<15x128xf32>
    %38 = arith.select %35, %33, %37 : vector<15x128xi1>, vector<15x128xf32>
    %c0_10 = arith.constant 0 : index
    %c0_11 = arith.constant 0 : index
    %39 = vector.load %arg5[%c0_10, %c0_11] : memref<2x15xf32, #tpu.memory_space<vmem>>, vector<2x15xf32>
    %cst_12 = arith.constant dense<0.000000e+00> : vector<2x128xf32>
    %40 = tpu.matmul %39, %38, %cst_12 {dimension_numbers = #tpu.dot_dimension_numbers<[1], [0], [0], [1], [0, 0, 1, 1], [], []>} : vector<2x15xf32>, vector<15x128xf32>, vector<2x128xf32> -> vector<2x128xf32>
    %c0_13 = arith.constant 0 : index
    %c0_14 = arith.constant 0 : index
    %41 = vector.load %arg6[%c0_13, %c0_14] : memref<2x1xf32, #tpu.memory_space<vmem>>, vector<2x1xf32>
    %42 = vector.broadcast %41 : vector<2x1xf32> to vector<2x128xf32>
    %43 = arith.addf %40, %42 : vector<2x128xf32>
    %c0_15 = arith.constant 0 : index
    %c0_16 = arith.constant 0 : index
    %44 = vector.load %arg7[%c0_15, %c0_16] : memref<2x128xf32, #tpu.memory_space<vmem>>, vector<2x128xf32>
    tpu.vector_store %arg7[%c0_15, %c0_16], %43 {strides = array<i32>} : memref<2x128xf32, #tpu.memory_space<vmem>>, vector<2x128xf32>,
    return
  }
  func.func @transform_0(%arg0: i32, %arg1: memref<1xi32, #tpu.memory_space<smem>>) -> (i32, i32) {
    %c0_i32 = arith.constant 0 : i32
    %c0_i32_0 = arith.constant 0 : i32
    return %c0_i32, %arg0 : i32, i32
  }
  func.func @transform_1(%arg0: i32, %arg1: memref<1xi32, #tpu.memory_space<smem>>) -> (i32, i32) {
    %c0_i32 = arith.constant 0 : i32
    %c0_i32_0 = arith.constant 0 : i32
    %c0_i32_1 = arith.constant 0 : i32
    return %c0_i32, %c0_i32_0 : i32, i32
  }
  func.func @transform_2(%arg0: i32, %arg1: memref<1xi32, #tpu.memory_space<smem>>) -> (i32, i32) {
    %c0_i32 = arith.constant 0 : i32
    %c0_i32_0 = arith.constant 0 : i32
    %c0_i32_1 = arith.constant 0 : i32
    return %c0_i32, %c0_i32_0 : i32, i32
  }
  func.func @transform_3(%arg0: i32, %arg1: memref<1xi32, #tpu.memory_space<smem>>) -> (i32, i32) {
    %c0_i32 = arith.constant 0 : i32
    %c0_i32_0 = arith.constant 0 : i32
    %c0_i32_1 = arith.constant 0 : i32
    return %c0_i32, %c0_i32_0 : i32, i32
  }
  func.func @transform_4(%arg0: i32, %arg1: memref<1xi32, #tpu.memory_space<smem>>) -> (i32, i32) {
    %c0_i32 = arith.constant 0 : i32
    %c0_i32_0 = arith.constant 0 : i32
    %c0_i32_1 = arith.constant 0 : i32
    return %c0_i32, %c0_i32_0 : i32, i32
  }
  func.func @transform_5(%arg0: i32, %arg1: memref<1xi32, #tpu.memory_space<smem>>) -> (i32, i32) {
    %c0_i32 = arith.constant 0 : i32
    %c0_i32_0 = arith.constant 0 : i32
    return %c0_i32, %arg0 : i32, i32
  }
}

</mosaic_0001>

<bundles_post_ra>
// kernel: _fcn_forward.1
= control target key start
LH: loop header
LB: loop body
LE: loop exit
PB: predicated region body
PF: predicated region fallthrough
CT: control target
= control target key end

     0   :  { %v23_v0 = vlaneseq  ;;  %vm59_vm0 = vcmask 64512   ;;  %v271_v2 = vmov 0   ;;  %v272_v21 = vmov 0.0|0.0   ;;  %s340_s2 = inlined_call_operand.vmem [shape: f32[15,8], index: 2, kind: input, shape index: {}]   ;;  %s341_s3 = inlined_call_operand.vmem [shape: f32[15,1], index: 3, kind: input, shape index: {}]   ;;  %s342_s0 = inlined_call_operand.<no memory space> [shape: s32[1], index: 0, kind: input, shape index: {}]   ;;  %s343_s1 = inlined_call_operand.vmem [shape: f32[8,128], index: 1, kind: input, shape index: {}]   ;;  %s344_s5 = inlined_call_operand.vmem [shape: f32[2,1], index: 5, kind: input, shape index: {}]   ;;  %s345_s4 = inlined_call_operand.vmem [shape: f32[2,15], index: 4, kind: input, shape index: {}]   ;;  %s346_s6 = inlined_call_operand.vmem [shape: f32[2,128], index: 6, kind: output, shape index: {}]  }
   0x1   :  { %v45_v1 = vld [vmem:[%s340_s2] sm:$0xff]  ;;  %269 = vset.pattern.permute.xlu0 %v271_v2  ;;  %270 = vset.pattern.permute.xlu1 %v271_v2  ;;  %v48_v7 = vld [vmem:[%s341_s3 + $0x8] sm:$0x7f]  ;;  %v33_v8 = vstv %s342_s0  ;;  %vm273_vm2 = vmmov 0   ;;  %v274_v22 = vmov 0.0   ;;  %vm158_vm4 = vcmask 1046528  }
   0x2   :  { %v24_v3 = vshrl.u32 %v23_v0, 7  ;;  %v26_v4 = vand.u32 127, %v23_v0  ;;  %250 = vmatprep.mubr.msk.f32.mxu0 %vm59_vm0, %v45_v1  ;;  %v47_v5 = vld [vmem:[%s341_s3] sm:$0xff]  ;;  %v46_v20 = vld [vmem:[%s340_s2 + $0x8] sm:$0x7f]  ;;  %260 = vmatprep.subr.bf16.mxu1 %v272_v21  ;;  %vm275_vm6 = vmmov 1  }
   0x3   :  { %51 = vperm.xlu0 %269, %v47_v5   ;;  %v22_v18 = vld [vmem:[%s343_s1] sm:$0xff]  ;;  %257 = vmatprep.mubr.msk.f32.mxu1 %vm273_vm2, %v274_v22  ;;  %vm262_vm7 = vmpackc.low %vm158_vm4, %vm275_vm6  ;;  %vm154_vm8 = vcmask 121856  }
   0x4   :  { %v30_v6 = vmul.u32 8, %v26_v4  ;;  %v148_v23 = vld [vmem:[%s344_s5] sm:$0x3] }
   0x5   :  { %151 = vperm.xlu1 %270, %v148_v23   ;;  %v147_v35 = vld [vmem:[%s345_s4] sm:$0x3] }
   0x6   :  { %v31_v9 = vadd.s32 %v30_v6, %v24_v3 }
   0x7   :  { %56 = vperm.xlu0 %269, %v48_v7  }
   0x8   :  { %v34_v10 = vxor.u32 %v33_v8, %v31_v9 }
   0xa   :  { %v35_v11 = vshrl.u32 %v34_v10, 16 }
   0xc   :  { %v36_v12 = vxor.u32 %v35_v11, %v34_v10 }
   0xe   :  { %v37_v13 = vmul.u32 2246822507, %v36_v12 }
  0x10   :  { %v38_v14 = vshrl.u32 %v37_v13, 13 }
  0x12   :  { %v39_v15 = vxor.u32 %v38_v14, %v37_v13 }
  0x14   :  { %v40_v16 = vmul.u32 3266489909, %v39_v15 }
  0x16   :  { %v41_v17 = vshrl.u32 %v40_v16, 16 }
  0x18   :  { %v42_v19 = vxor.u32 %v41_v17, %v40_v16 }
  0x1a   :  { %vm43_vm1 = vcmp.lt.u32.totalorder %v42_v19, 3006477107 }
  0x1b   :  { %248 = vmatprep.subr.msk.mxu0 %vm43_vm1, %v22_v18 }
  0x1c   :  { %249 = vmatpush3.msk.msra.mxu0 %vm43_vm1, %v22_v18 }
  0x1d   :  { %251 = vmatmul.mubr.msk.f32.vlgmr.msra.gmra.mrb[0].mxu0 %vm59_vm0, %v46_v20 }
  0x82   :  { %v52_v24 = vpop.permute.xlu0 %51 }
  0x84   :  { %v152_v36 = vpop.permute.xlu1 %151 }
  0x86   :  { %v57_v25 = vpop.permute.xlu0 %56 }
  0xf0   :  { %v252_v26 = vpop.f32.mrb[0].mxu0 }
  0xf1   :  { %v138_v27 = vadd.f32 %v252_v26, %v57_v25  ;;  %v132_v28 = vpop.f32.mrb[1].mxu0 }
  0xf2   :  { %v133_v29 = vadd.f32 %v132_v28, %v52_v24 }
  0xf3   :  { %vm142_vm3 = vcmp.gt.f32.partialorder %v138_v27, 0.0  ;;  %v144_v30 = vmul.f32 0.01, %v138_v27 }
  0xf4   :  { %vm141_vm5 = vcmp.gt.f32.partialorder %v133_v29, 0.0  ;;  %v143_v31 = vmul.f32 0.01, %v133_v29 }
  0xf5   :  { %v146_v32 = vsel %vm142_vm3, %v138_v27, %v144_v30 }
  0xf6   :  { %v145_v33 = vsel %vm141_vm5, %v133_v29, %v143_v31 }
  0xf7   :  { %v261_v34 = vpack.c.bf16 %v146_v32, %v145_v33 }
  0xf9   :  { %263 = vmatpush3.bf16.msk.msra.mxu1 %vm262_vm7, %v261_v34 }
  0xfc   :  { %258 = vmatmul.mubr.msk.f32.vlgmr.msra.gmra.mrb[0].mxu1 %vm154_vm8, %v147_v35 }
 0x1cf   :  { %v228_v37 = vpop.f32.mrb[0].mxu1 }
 0x1d0   :  { %v229_v38 = vadd.f32 %v228_v37, %v152_v36  ;;  %v259_v39 = vpop.f32.mrb[1].mxu1 }
 0x1d2   :  { %232 = vst [vmem:[%s346_s6] sm:$0x3] %v229_v38 }

</bundles_post_ra>
